<compile_context>
chip_gen: v6e
topology: v6e:2x2x1
jax: 0.10.0
libtpu: 0.0.40
codegen_flags: <defaults>
</compile_context>

<pallas_src>
import functools

import jax
import jax.numpy as jnp
from jax.experimental import pallas as pl
from jax.experimental.pallas import tpu as pltpu

EPS = 1e-5


def _round_up(x, m):
    return ((x + m - 1) // m) * m


def _func_apply_kernel(x_ref, w_ref, b_ref, o_ref, xn_ref):
    # x_ref : (TM, D)   input rows (bf16 or f32), resident across the j loop
    # w_ref : (D, TN)   weight column tile (MXU dtype), streams over j
    # b_ref : (1, TN)   bias column tile (f32)
    # o_ref : (TM, TN)  output tile
    # xn_ref: (TM, D)   VMEM scratch holding the normalized rows in MXU dtype,
    #                   computed once per row tile (j == 0) and reused for all j.

    @pl.when(pl.program_id(1) == 0)
    def _compute_stats_and_normalize():
        x = x_ref[...].astype(jnp.float32)
        # ---- func(x): per-row mean and biased variance over hidden dim ----
        mu = jnp.mean(x, axis=-1, keepdims=True)
        diff = x - mu
        var = jnp.mean(diff * diff, axis=-1, keepdims=True)
        # ---- normalize (f32) and cast ONCE to the MXU operand dtype ----
        xn = diff * jax.lax.rsqrt(var + EPS)
        xn_ref[...] = xn.astype(xn_ref.dtype)

    # ---- wrapped(x, mu, var): Linear on the MXU, f32 accumulation ----
    out = jnp.dot(xn_ref[...], w_ref[...], preferred_element_type=jnp.float32)
    out = out + b_ref[...].astype(jnp.float32)
    o_ref[...] = out.astype(o_ref.dtype)


def prepare_params(w, b, *, col_tile=256, mxu_dtype=jnp.bfloat16,
                   resident_w_bytes=8 << 20):
    """One-time weight/bias preparation (cast + lane-align pad).

    Done OUTSIDE the jitted forward so the bf16 copy of W is materialized once,
    not on every call.  Returns (w_padded, b_padded[1, Hpad], col_tile_used).
    """
    D, H = w.shape
    itemsize = jnp.dtype(mxu_dtype).itemsize
    h_lane = _round_up(H, 128)
    if D * h_lane * itemsize <= resident_w_bytes:
        # Resident-W fast path: one column tile = whole (padded) weight.
        # The weight BlockSpec index map is then constant -> DMA'd once,
        # reused across every row tile, and the j grid axis has extent 1.
        tn = h_lane
    else:
        tn = min(col_tile, h_lane)
    h_pad = _round_up(H, tn)

    w_p = w.astype(mxu_dtype)
    b_p = b.astype(jnp.float32)
    if h_pad != H:
        w_p = jnp.pad(w_p, ((0, 0), (0, h_pad - H)))
        b_p = jnp.pad(b_p, (0, h_pad - H))
    return w_p, b_p.reshape(1, h_pad), tn


@functools.partial(
    jax.jit,
    static_argnames=("out_features", "col_tile", "row_tile", "x_dtype",
                     "out_dtype", "vmem_limit_bytes"))
def func_apply_wrapper_forward(x, w_p, b_p, *, out_features, col_tile,
                               row_tile=512, x_dtype=jnp.bfloat16,
                               out_dtype=None, vmem_limit_bytes=64 << 20):
    """x: [B, S, D]; w_p/b_p from prepare_params() -> [B, S, out_features].

    row_tile: 512 is a safe default across v5e/v6e/v7x with the bf16-x path
    (x block 512xD bf16 double-buffered + xn scratch + streamed W tiles stay
    well under the explicit vmem_limit_bytes).  On v6e, 1024 is worth sweeping.
    """
    B, S, D = x.shape
    H = out_features
    h_pad = w_p.shape[1]
    tn = col_tile
    M = B * S
    out_dtype = x.dtype if out_dtype is None else out_dtype

    # Row tile: big for real shapes, clamped (and sublane-aligned) for small
    # demo shapes.
    tm = min(row_tile, _round_up(M, 8))
    m_pad = _round_up(M, tm)

    # Cast x ONCE in the wrapper (bf16 on the perf path halves HBM read traffic
    # and halves the resident (tm, D) VMEM block); pad rows to the tile.
    x2 = x.reshape(M, D).astype(x_dtype)
    if m_pad != M:
        x2 = jnp.pad(x2, ((0, m_pad - M), (0, 0)))

    grid = (m_pad // tm, h_pad // tn)

    out2 = pl.pallas_call(
        _func_apply_kernel,
        out_shape=jax.ShapeDtypeStruct((m_pad, h_pad), out_dtype),
        grid_spec=pltpu.PrefetchScalarGridSpec(
            num_scalar_prefetch=0,
            grid=grid,
            in_specs=[
                # x rows tile: depends only on i -> resident across the inner
                # j loop while weight columns stream.
                pl.BlockSpec((tm, D), lambda i, j: (i, 0)),
                # weight column tile: streams over j (constant if grid[1]==1,
                # i.e. the resident-W fast path -> single DMA, reused).
                pl.BlockSpec((D, tn), lambda i, j: (0, j)),
                # bias column tile.
                pl.BlockSpec((1, tn), lambda i, j: (0, j)),
            ],
            out_specs=pl.BlockSpec((tm, tn), lambda i, j: (i, j)),
            # Normalized-row cache in the MXU operand dtype; written at j==0,
            # read by every j.  This is carried state across j, so the j axis
            # below must stay "arbitrary".
            scratch_shapes=[pltpu.VMEM((tm, D), w_p.dtype)],
        ),
        compiler_params=pltpu.CompilerParams(
            # i (rows) is independent -> "parallel" (megacore shards it on v7x).
            # j carries the xn scratch dependency -> "arbitrary".
            dimension_semantics=("parallel", "arbitrary"),
            vmem_limit_bytes=vmem_limit_bytes,
        ),
    )(x2, w_p, b_p)

    # Drop padded rows / columns.
    return out2[:M, :H].reshape(B, S, H)


def _reference(x, w, b):
    x = x.astype(jnp.float32)
    mu = jnp.mean(x, axis=-1, keepdims=True)
    var = jnp.mean((x - mu) ** 2, axis=-1, keepdims=True)
    xn = (x - mu) / jnp.sqrt(var + EPS)
    return jnp.einsum("bsd,dh->bsh", xn, w.astype(jnp.float32)) + b


if __name__ == "__main__":
    B, S, D, H = 2, 8, 32, 32

    key = jax.random.PRNGKey(0)
    kx, kw, kb = jax.random.split(key, 3)

    x = jax.random.normal(kx, (B, S, D), dtype=jnp.float32)
    # Deterministic in-script parameter init (Kaiming-ish scale for Linear).
    w = jax.random.normal(kw, (D, H), dtype=jnp.float32) * (1.0 / jnp.sqrt(D))
    b = jax.random.normal(kb, (H,), dtype=jnp.float32) * 0.01

    ref = _reference(x, w, b)

    # Exact-precision path (f32 x and f32 MXU operands): tight tolerance.
    w32, b32, tn32 = prepare_params(w, b, mxu_dtype=jnp.float32)
    out_f32 = func_apply_wrapper_forward(
        x, w32, b32, out_features=H, col_tile=tn32, x_dtype=jnp.float32)
    out_f32 = jax.block_until_ready(out_f32)
    assert out_f32.shape == (B, S, H)
    assert jnp.allclose(out_f32, ref, atol=1e-4, rtol=1e-4), "f32 path mismatch"

    # Default perf path (bf16 x + bf16 W into the MXU, f32 stats/accumulation):
    # expect ~1e-2-level relative error vs the f32 reference.
    w_bf, b_bf, tn_bf = prepare_params(w, b)  # one-time bf16 weight conversion
    out = func_apply_wrapper_forward(x, w_bf, b_bf, out_features=H,
                                     col_tile=tn_bf)
    out = jax.block_until_ready(out)
    assert out.shape == (B, S, H)
    assert jnp.allclose(out, ref, atol=5e-2, rtol=5e-2), "bf16 path mismatch"

    print("KERNEL_OK")
</pallas_src>

<mosaic_0001>
module attributes {stable_mosaic.version = 11 : i64} {
  func.func @_func_apply_kernel(%arg0: i32, %arg1: i32, %arg2: memref<16x32xf32, #tpu.memory_space<vmem>>, %arg3: memref<32x128xf32, #tpu.memory_space<vmem>>, %arg4: memref<1x128xf32, #tpu.memory_space<vmem>>, %arg5: memref<16x128xf32, #tpu.memory_space<vmem>>, %arg6: memref<16x32xf32, #tpu.memory_space<vmem>>) attributes {dimension_semantics = [#tpu.dimension_semantics<parallel>, #tpu.dimension_semantics<arbitrary>], iteration_bounds = array<i64: 1, 1>, scalar_prefetch = 0 : i64, scratch_operands = 1 : i64, tpu.core_type = #tpu.core_type<tc>, window_params = [{transform_indices = @transform_0, window_bounds = array<i64: 16, 32>}, {transform_indices = @transform_1, window_bounds = array<i64: 32, 128>}, {transform_indices = @transform_2, window_bounds = array<i64: 1, 128>}, {transform_indices = @transform_3, window_bounds = array<i64: 16, 128>}]} {
    %c0_i32 = arith.constant 0 : i32
    %0 = arith.cmpi eq, %arg1, %c0_i32 : i32
    %1 = arith.extui %0 : i1 to i32
    %c0_i32_0 = arith.constant 0 : i32
    %2 = arith.cmpi ne, %1, %c0_i32_0 : i32
    scf.if %2 {
      %c0_8 = arith.constant 0 : index
      %c0_9 = arith.constant 0 : index
      %10 = vector.load %arg2[%c0_8, %c0_9] : memref<16x32xf32, #tpu.memory_space<vmem>>, vector<16x32xf32>
      %cst_10 = arith.constant dense<0.000000e+00> : vector<16xf32>
      %11 = vector.multi_reduction <add>, %10, %cst_10 [1] : vector<16x32xf32> to vector<16xf32>
      %12 = vector.shape_cast %11 : vector<16xf32> to vector<16x1xf32>
      %cst_11 = arith.constant 3.200000e+01 : f32
      %13 = vector.broadcast %cst_11 : f32 to vector<16x1xf32>
      %14 = arith.divf %12, %13 : vector<16x1xf32>
      %15 = vector.broadcast %14 : vector<16x1xf32> to vector<16x32xf32>
      %16 = arith.subf %10, %15 : vector<16x32xf32>
      %17 = arith.mulf %16, %16 : vector<16x32xf32>
      %cst_12 = arith.constant dense<0.000000e+00> : vector<16xf32>
      %18 = vector.multi_reduction <add>, %17, %cst_12 [1] : vector<16x32xf32> to vector<16xf32>
      %19 = vector.shape_cast %18 : vector<16xf32> to vector<16x1xf32>
      %cst_13 = arith.constant 3.200000e+01 : f32
      %20 = vector.broadcast %cst_13 : f32 to vector<16x1xf32>
      %21 = arith.divf %19, %20 : vector<16x1xf32>
      %cst_14 = arith.constant 9.99999974E-6 : f32
      %22 = vector.broadcast %cst_14 : f32 to vector<16x1xf32>
      %23 = arith.addf %21, %22 : vector<16x1xf32>
      %24 = math.rsqrt %23 : vector<16x1xf32>
      %25 = vector.broadcast %24 : vector<16x1xf32> to vector<16x32xf32>
      %26 = arith.mulf %16, %25 : vector<16x32xf32>
      %c0_15 = arith.constant 0 : index
      %c0_16 = arith.constant 0 : index
      %27 = vector.load %arg6[%c0_15, %c0_16] : memref<16x32xf32, #tpu.memory_space<vmem>>, vector<16x32xf32>
      tpu.vector_store %arg6[%c0_15, %c0_16], %26 {strides = array<i32>} : memref<16x32xf32, #tpu.memory_space<vmem>>, vector<16x32xf32>,
    } else {
    }
    %c0 = arith.constant 0 : index
    %c0_1 = arith.constant 0 : index
    %3 = vector.load %arg6[%c0, %c0_1] : memref<16x32xf32, #tpu.memory_space<vmem>>, vector<16x32xf32>
    %c0_2 = arith.constant 0 : index
    %c0_3 = arith.constant 0 : index
    %4 = vector.load %arg3[%c0_2, %c0_3] : memref<32x128xf32, #tpu.memory_space<vmem>>, vector<32x128xf32>
    %cst = arith.constant dense<0.000000e+00> : vector<16x128xf32>
    %5 = tpu.matmul %3, %4, %cst {dimension_numbers = #tpu.dot_dimension_numbers<[1], [0], [0], [1], [0, 0, 1, 1], [], []>} : vector<16x32xf32>, vector<32x128xf32>, vector<16x128xf32> -> vector<16x128xf32>
    %c0_4 = arith.constant 0 : index
    %c0_5 = arith.constant 0 : index
    %6 = vector.load %arg4[%c0_4, %c0_5] : memref<1x128xf32, #tpu.memory_space<vmem>>, vector<1x128xf32>
    %7 = vector.broadcast %6 : vector<1x128xf32> to vector<16x128xf32>
    %8 = arith.addf %5, %7 : vector<16x128xf32>
    %c0_6 = arith.constant 0 : index
    %c0_7 = arith.constant 0 : index
    %9 = vector.load %arg5[%c0_6, %c0_7] : memref<16x128xf32, #tpu.memory_space<vmem>>, vector<16x128xf32>
    tpu.vector_store %arg5[%c0_6, %c0_7], %8 {strides = array<i32>} : memref<16x128xf32, #tpu.memory_space<vmem>>, vector<16x128xf32>,
    return
  }
  func.func @transform_0(%arg0: i32, %arg1: i32) -> (i32, i32) {
    %c0_i32 = arith.constant 0 : i32
    %c0_i32_0 = arith.constant 0 : i32
    return %arg0, %c0_i32 : i32, i32
  }
  func.func @transform_1(%arg0: i32, %arg1: i32) -> (i32, i32) {
    %c0_i32 = arith.constant 0 : i32
    %c0_i32_0 = arith.constant 0 : i32
    return %c0_i32, %arg1 : i32, i32
  }
  func.func @transform_2(%arg0: i32, %arg1: i32) -> (i32, i32) {
    %c0_i32 = arith.constant 0 : i32
    %c0_i32_0 = arith.constant 0 : i32
    return %c0_i32, %arg1 : i32, i32
  }
  func.func @transform_3(%arg0: i32, %arg1: i32) -> (i32, i32) {
    %c0_i32 = arith.constant 0 : i32
    return %arg0, %arg1 : i32, i32
  }
}

</mosaic_0001>

<bundles_post_ra>
// kernel: func_apply_wrapper_forward.1
= control target key start
LH: loop header
LB: loop body
LE: loop exit
PB: predicated region body
PF: predicated region fallthrough
CT: control target
= control target key end

     0   :  { %8 = vsyncpa [#allocation4], 0  ;;  %s300_s0 = inlined_call_operand.hbm [shape: f32[16,32], index: 0, kind: input, shape index: {}]   ;;  %s301_s1 = inlined_call_operand.hbm [shape: f32[32,128], index: 1, kind: input, shape index: {}]   ;;  %s302_s2 = inlined_call_operand.vmem [shape: f32[1,128], index: 2, kind: input, shape index: {}]   ;;  %s303_s3 = inlined_call_operand.vmem [shape: f32[16,128], index: 3, kind: output, shape index: {}]  }
   0x1   :  { %9 = vsyncpa [#allocation6], 0  ;;  %s253_s12 = smov [#allocation3]  }
   0x2   :  { %s15_s13 = sshll.u32 %s253_s12, 4  ;;  %s16_s13 = int_to_ptr.vmem [resolvable:$true] %s15_s13 }
   0x3   :  { %s217_s14 = scalar_lea.vmem %s16_s13, 256  ;;  %p222_p1 = scmp.lt.s32.totalorder %s16_s13, %s16_s13 }
   0x4   :  { %p218_p0 = scmp.ne.s32.totalorder %s16_s13, %s217_s14  ;;  %p223_p2 = scmp.lt.s32.totalorder %s217_s14, %s217_s14 }
   0x6   :  { %p224_p3 = por %p223_p2, %p222_p1 }
   0x8   :  { %p225_p4 = pnand %p224_p3, %p218_p0 }
   0xa   :  { %228 = shalt.err (!%p225_p4)
}
   0xb   :  { %s254_s15 = smov 128   ;;  %s255_s16 = smov 8  }
   0xc   :  { %21 = dma.hbm_to_vmem [thread:$0]  %s300_s0, 256, %s16_s13, [#allocation4], %s254_s15, %s254_s15, %s255_s16  }
   0xd   :  { %s256_s19 = smov [#allocation5]  }
   0xe   :  { %s27_s20 = sshll.u32 %s256_s19, 4  ;;  %s28_s20 = int_to_ptr.vmem [resolvable:$true] %s27_s20 }
   0xf   :  { %s237_s21 = scalar_lea.vmem %s28_s20, 512  ;;  %p242_p6 = scmp.lt.s32.totalorder %s28_s20, %s28_s20 }
  0x10   :  { %p238_p5 = scmp.ne.s32.totalorder %s28_s20, %s237_s21  ;;  %p243_p7 = scmp.lt.s32.totalorder %s237_s21, %s237_s21 }
  0x12   :  { %p244_p8 = por %p243_p7, %p242_p6 }
  0x14   :  { %p245_p9 = pnand %p244_p8, %p238_p5 }
  0x16   :  { %248 = shalt.err (!%p245_p9)
}
  0x17   :  { %33 = dma.hbm_to_vmem [thread:$0]  %s301_s1, 512, %s28_s20, [#allocation6], %s254_s15, %s254_s15, %s255_s16  }
  0x18   :  { %249 = dma.done.wait [#allocation4], 256  }
  0x19   :  { %250 = vsyncadd [#allocation4], 4294967040 }
  0x1a   :  { %251 = dma.done.wait [#allocation6], 512  }
  0x1b   :  { %252 = vsyncadd [#allocation6], 4294966784  ;;  %vm48_vm0 = vcmask 261120   ;;  %v46_v0 = vld [vmem:[#allocation3] sm:$0xff]  ;;  %v47_v1 = vld [vmem:[#allocation3 + $0x8] sm:$0xff] }
  0x1c   :  { %v49_v2 = vsel %vm48_vm0, %v46_v0, 0.0  ;;  %v52_v3 = vsel %vm48_vm0, %v47_v1, 0.0  ;;  %v83_v14 = vld [vmem:[#allocation5 + $0x18] sm:$0xff]  ;;  %v82_v15 = vld [vmem:[#allocation5 + $0x10] sm:$0xff]  ;;  %v81_v16 = vld [vmem:[#allocation5 + $0x8] sm:$0xff] }
  0x1d   :  { %50 = vadd.xlane.f32.xlu0 %v49_v2  ;;  %190 = vmatprep.subr.mxu0 %v83_v14  ;;  %v80_v17 = vld [vmem:[#allocation5] sm:$0xff] }
  0x1e   :  { %191 = vmatpush3.msra.mxu0 %v83_v14  ;;  %v181_v30 = vld [vmem:[%s302_s2] ss:$0 sm:$0xff] }
  0x1f   :  { %192 = vmatprep.subr.mxu0 %v82_v15 }
  0x20   :  { %193 = vmatpush3.msra.mxu0 %v82_v15 }
  0x21   :  { %53 = vadd.xlane.f32.xlu0 %v52_v3  ;;  %194 = vmatprep.subr.mxu0 %v81_v16 }
  0x22   :  { %195 = vmatpush3.msra.mxu0 %v81_v16 }
  0x23   :  { %196 = vmatprep.subr.mxu0 %v80_v17 }
  0x24   :  { %197 = vmatpush3.msra.mxu0 %v80_v17 }
  0xa6   :  { %v51_v4 = vpop.xlane.xlu0 %50 }
  0xa7   :  { %v56_v5 = vmul.f32 0.03125, %v51_v4 }
  0xa9   :  { %v58_v6 = vsub.f32 %v46_v0, %v56_v5 }
  0xaa   :  { %v54_v7 = vpop.xlane.xlu0 %53 }
  0xab   :  { %v57_v8 = vmul.f32 0.03125, %v54_v7  ;;  %v60_v9 = vmul.f32 %v58_v6, %v58_v6 }
  0xad   :  { %v59_v10 = vsub.f32 %v47_v1, %v57_v8  ;;  %v62_v11 = vsel %vm48_vm0, %v60_v9, 0.0 }
  0xae   :  { %63 = vadd.xlane.f32.xlu1 %v62_v11 }
  0xaf   :  { %v61_v12 = vmul.f32 %v59_v10, %v59_v10 }
  0xb1   :  { %v65_v13 = vsel %vm48_vm0, %v61_v12, 0.0 }
  0xb2   :  { %66 = vadd.xlane.f32.xlu1 %v65_v13 }
 0x137   :  { %v64_v18 = vpop.xlane.xlu1 %63 }
 0x138   :  { %v68_v19 = vmul.f32 0.03125, %v64_v18 }
 0x13a   :  { %v70_v20 = vadd.f32 1e-05, %v68_v19 }
 0x13b   :  { %v67_v21 = vpop.xlane.xlu1 %66 }
 0x13c   :  { %205 = vrsqrt.f32 %v70_v20  ;;  %v69_v22 = vmul.f32 0.03125, %v67_v21 }
 0x13e   :  { %v71_v23 = vadd.f32 1e-05, %v69_v22 }
 0x140   :  { %207 = vrsqrt.f32 %v71_v23 }
 0x149   :  { %v206_v24 = vpop.eup %205 }
 0x14a   :  { %v74_v25 = vmul.f32 %v206_v24, %v58_v6 }
 0x14c   :  { %76 = vst.msk [vmem:[#allocation2] sm:$0xff] %vm48_vm0, %v74_v25 }
 0x14d   :  { %v208_v26 = vpop.eup %207 }
 0x14e   :  { %v75_v27 = vmul.f32 %v208_v26, %v59_v10 }
 0x150   :  { %77 = vst.msk [vmem:[#allocation2 + $0x8] sm:$0xff] %vm48_vm0, %v75_v27 }
 0x153   :  { %v78_v28 = vld [vmem:[#allocation2] sm:$0xff] }
 0x154   :  { %198 = vmatprep.mubr.msk.f32.mxu0 %vm48_vm0, %v78_v28 }
 0x157   :  { %v79_v29 = vld [vmem:[#allocation2 + $0x8] sm:$0xff] }
 0x158   :  { %199 = vmatmul.mubr.msk.f32.vlgmr.msra.gmra.mxu0 %vm48_vm0, %v79_v29 }
 0x218   :  { %v200_v31 = vpop.f32.mrf.mxu0 }
 0x219   :  { %v170_v32 = vadd.f32 %v200_v31, %v181_v30 }
 0x21a   :  { %v164_v33 = vpop.f32.mrf.mxu0 }
 0x21b   :  { %174 = vst [vmem:[%s303_s3 + $0x8] sm:$0xff] %v170_v32  ;;  %v165_v34 = vadd.f32 %v181_v30, %v164_v33 }
 0x21d   :  { %173 = vst [vmem:[%s303_s3] sm:$0xff] %v165_v34 }
 0x21e   :  { %179 = vsyncpa [#allocation4], 1 }
 0x21f   :  { %180 = vsyncpa [#allocation6], 1 }

</bundles_post_ra>
